<compile_context>
chip_gen: v6e
topology: v6e:2x2x1
jax: 0.10.0
libtpu: 0.0.40
codegen_flags: <defaults>
</compile_context>

<pallas_src>
import math
import functools

import jax
import jax.numpy as jnp
from jax.experimental import pallas as pl
from jax.experimental.pallas import tpu as pltpu


# ------------------------------------------------------------------
# Fused Pallas kernel
# ------------------------------------------------------------------

def fused_subsample_posenc_ln_kernel(
    xw_ref,    # (1, tt, 3*F)   bf16  windowed input rows  [kt*F + j]
    wc_ref,    # (3*F, Fp*C)    bf16  banded conv weight   [kt*F + j, f'*C + c]
    bc_ref,    # (1, Fp*C)      f32   tiled conv bias
    wl_ref,    # (Fp*C, D)      bf16  permuted Linear weight (sqrt(d_model) folded in)
    bl_ref,    # (1, D)         f32   Linear bias (sqrt(d_model) folded in)
    pe_ref,    # (tt, D)        f32   positional-encoding rows for this time tile
    g_ref,     # (1, D)         f32   LayerNorm gamma
    b_ref,     # (1, D)         f32   LayerNorm beta
    out_ref,   # (1, tt, D)     f32
    *,
    eps,
):
    x = xw_ref[0]                                              # (tt, 3F) bf16

    # Conv2d(1, C, 3, stride=2) + bias + ReLU  (banded dense matmul, f32 accumulate)
    h = jnp.dot(x, wc_ref[...], preferred_element_type=jnp.float32)
    h = jnp.maximum(h + bc_ref[...], 0.0)                      # (tt, Fp*C) f32

    # Linear (xscale folded into weight/bias) + positional encoding
    z = jnp.dot(h.astype(jnp.bfloat16), wl_ref[...],
                preferred_element_type=jnp.float32)
    z = z + bl_ref[...] + pe_ref[...]                          # (tt, D) f32

    # LayerNorm(eps=1e-5), single-pass variance, all in f32
    mean = jnp.mean(z, axis=-1, keepdims=True)
    var = jnp.mean(z * z, axis=-1, keepdims=True) - mean * mean
    zn = (z - mean) * jax.lax.rsqrt(var + eps)
    out_ref[0] = (zn * g_ref[...] + b_ref[...]).astype(out_ref.dtype)


# ------------------------------------------------------------------
# Parameter / input preparation (cheap XLA glue, done once)
# ------------------------------------------------------------------

def _sinusoidal_pe(length, d_model):
    pos = jnp.arange(length, dtype=jnp.float32)[:, None]
    div = jnp.exp(jnp.arange(0, d_model, 2, dtype=jnp.float32)
                  * -(math.log(10000.0) / d_model))
    pe = jnp.zeros((length, d_model), jnp.float32)
    pe = pe.at[:, 0::2].set(jnp.sin(pos * div))
    pe = pe.at[:, 1::2].set(jnp.cos(pos * div))
    return pe


def _prepare_params(params, F, d_model):
    """Fold layout permutations + xscale into the weights once."""
    C = d_model
    Fp = (F - 3) // 2 + 1
    conv_w = params["conv_w"].astype(jnp.float32)          # (C, 1, 3, 3)
    conv_b = params["conv_b"].astype(jnp.float32)          # (C,)
    lin_w = params["lin_w"].astype(jnp.float32)            # (D, C*Fp)  torch layout (c*Fp + f')
    lin_b = params["lin_b"].astype(jnp.float32)            # (D,)
    xscale = math.sqrt(d_model)

    # Banded conv weight: wc_big[kt*F + j, f'*C + c] = conv_w[c, 0, kt, j - 2f']  (0 outside band)
    wc = conv_w[:, 0]                                       # (C, 3, 3)
    j = jnp.arange(F)[None, :]                              # (1, F)
    fp = jnp.arange(Fp)[:, None]                            # (Fp, 1)
    kf = j - 2 * fp                                         # (Fp, F)
    valid = ((kf >= 0) & (kf <= 2)).astype(jnp.float32)
    band = wc[:, :, jnp.clip(kf, 0, 2)]                     # (C, 3, Fp, F)
    band = band * valid[None, None]
    wc_big = jnp.transpose(band, (1, 3, 2, 0)).reshape(3 * F, Fp * C)

    bc_big = jnp.tile(conv_b, Fp).reshape(1, Fp * C)        # index f'*C + c -> conv_b[c]

    # Linear weight permuted so its input-feature order matches the conv output layout
    # (f' major, channel minor); sqrt(d_model) folded in.
    wl = lin_w.reshape(d_model, C, Fp)                      # [d, c, f']
    wl = jnp.transpose(wl, (2, 1, 0)).reshape(Fp * C, d_model) * xscale
    bl = (lin_b * xscale).reshape(1, d_model)

    return (wc_big.astype(jnp.bfloat16), bc_big,
            wl.astype(jnp.bfloat16), bl,
            params["ln_g"].astype(jnp.float32).reshape(1, d_model),
            params["ln_b"].astype(jnp.float32).reshape(1, d_model))


# ------------------------------------------------------------------
# BaseEncoder.forward
# ------------------------------------------------------------------

def base_encoder_forward(xs, xs_lens, params, d_model, time_tile=None):
    """Mirrors BaseEncoder.forward (input_layer='conv2d', pos_enc='abs_pos',
    normalize_before=True, no global_cmvn, no encoder layers, inference)."""
    B, T, F = xs.shape
    assert T >= 3 and F >= 3
    Tp = (T - 3) // 2 + 1       # conv output time
    Fp = (F - 3) // 2 + 1       # conv output freq
    C = d_model
    K1 = 3 * F
    K2 = Fp * C

    # masks = ~make_pad_mask(xs_lens, T).unsqueeze(1)
    masks = (jnp.arange(T)[None, :] < xs_lens[:, None])[:, None, :]     # (B, 1, T) bool

    # Time-windowed, lane-dense input: xs_win[b, t', kt*F + j] = xs[b, 2t'+kt, j]
    wins = [xs[:, kt:kt + 2 * Tp:2, :][:, :Tp] for kt in range(3)]
    xs_win = jnp.stack(wins, axis=2).reshape(B, Tp, K1).astype(jnp.bfloat16)

    pe = _sinusoidal_pe(Tp, d_model)                                    # (Tp, D) f32

    # Row (time) tile; pad Tp to a multiple of the tile if needed.
    if time_tile is None:
        time_tile = Tp
        for cand in (256, 128, 64, 32, 16, 8):
            if Tp >= cand:
                time_tile = cand
                break
    tt = time_tile
    Tp_pad = ((Tp + tt - 1) // tt) * tt
    if Tp_pad != Tp:
        xs_win = jnp.pad(xs_win, ((0, 0), (0, Tp_pad - Tp), (0, 0)))
        pe = jnp.pad(pe, ((0, Tp_pad - Tp), (0, 0)))

    wc_big, bc_big, wl, bl, gamma, beta = _prepare_params(params, F, d_model)

    kern = functools.partial(fused_subsample_posenc_ln_kernel, eps=1e-5)
    out = pl.pallas_call(
        kern,
        out_shape=jax.ShapeDtypeStruct((B, Tp_pad, d_model), jnp.float32),
        grid=(B, Tp_pad // tt),
        in_specs=[
            pl.BlockSpec((1, tt, K1), lambda b, i: (b, i, 0)),      # xs_win tile
            pl.BlockSpec((K1, K2), lambda b, i: (0, 0)),            # conv weight (resident)
            pl.BlockSpec((1, K2), lambda b, i: (0, 0)),             # conv bias
            pl.BlockSpec((K2, d_model), lambda b, i: (0, 0)),       # linear weight (resident)
            pl.BlockSpec((1, d_model), lambda b, i: (0, 0)),        # linear bias
            pl.BlockSpec((tt, d_model), lambda b, i: (i, 0)),       # pe rows for this tile
            pl.BlockSpec((1, d_model), lambda b, i: (0, 0)),        # LN gamma
            pl.BlockSpec((1, d_model), lambda b, i: (0, 0)),        # LN beta
        ],
        out_specs=pl.BlockSpec((1, tt, d_model), lambda b, i: (b, i, 0)),
        compiler_params=pltpu.CompilerParams(
            dimension_semantics=("parallel", "parallel"),
            vmem_limit_bytes=48 * 1024 * 1024,
        ),
    )(xs_win, wc_big, bc_big, wl, bl, pe, gamma, beta)

    out = out[:, :Tp]                                   # drop padded rows
    masks_sub = masks[:, :, :-2:2]                      # (B, 1, Tp)
    return out, masks_sub


# ------------------------------------------------------------------
# Pure-JAX reference (same bf16-operand / f32-accumulate matmul precision)
# ------------------------------------------------------------------

def _reference_forward(xs, xs_lens, params, d_model):
    B, T, F = xs.shape
    Tp = (T - 3) // 2 + 1
    Fp = (F - 3) // 2 + 1
    C = d_model
    cols = []
    for kt in range(3):
        for kf in range(3):
            cols.append(xs[:, kt:kt + 2 * Tp:2, kf:kf + 2 * Fp:2][:, :Tp, :Fp])
    patches = jnp.stack(cols, axis=-1)                                  # (B, Tp, Fp, 9)
    w9 = params["conv_w"].reshape(C, 9)
    conv = jnp.einsum("btfk,ck->btfc",
                      patches.astype(jnp.bfloat16), w9.astype(jnp.bfloat16),
                      preferred_element_type=jnp.float32)
    conv = jnp.maximum(conv + params["conv_b"], 0.0)                    # (B, Tp, Fp, C)
    h = jnp.transpose(conv, (0, 1, 3, 2)).reshape(B, Tp, C * Fp)        # torch (c*Fp + f') order
    z = jnp.einsum("btk,dk->btd",
                   h.astype(jnp.bfloat16), params["lin_w"].astype(jnp.bfloat16),
                   preferred_element_type=jnp.float32) + params["lin_b"]
    z = z * math.sqrt(d_model) + _sinusoidal_pe(Tp, d_model)[None]
    mean = jnp.mean(z, axis=-1, keepdims=True)
    var = jnp.mean((z - mean) ** 2, axis=-1, keepdims=True)
    zn = (z - mean) * jax.lax.rsqrt(var + 1e-5)
    out = zn * params["ln_g"] + params["ln_b"]
    masks = (jnp.arange(T)[None, :] < xs_lens[:, None])[:, None, :]
    return out, masks[:, :, :-2:2]


# ------------------------------------------------------------------
# main
# ------------------------------------------------------------------

if __name__ == "__main__":
    # Small shapes consistent with the module: xs (B, T, D_in), xs_lens (B,)
    B, T, D_in = 2, 65, 16
    d_model = 128                 # output_size; multiple of 128 -> lane-dense stores

    key = jax.random.PRNGKey(0)
    k_x, k_cw, k_cb, k_lw, k_lb = jax.random.split(key, 5)

    xs = jax.random.normal(k_x, (B, T, D_in), dtype=jnp.float32)
    xs_lens = jnp.array([65, 50], dtype=jnp.int32)

    Fp = (D_in - 3) // 2 + 1
    lin_in = d_model * Fp
    params = {
        # Conv2d(1, d_model, 3, 2) weights: (out_ch, in_ch=1, 3, 3)
        "conv_w": jax.random.normal(k_cw, (d_model, 1, 3, 3), jnp.float32) * (1.0 / 3.0),
        "conv_b": jax.random.normal(k_cb, (d_model,), jnp.float32) * 0.1,
        # Linear(d_model * ((D_in-1)//2), d_model) weights: (out, in)
        "lin_w": jax.random.normal(k_lw, (d_model, lin_in), jnp.float32) * (1.0 / math.sqrt(lin_in)),
        "lin_b": jax.random.normal(k_lb, (d_model,), jnp.float32) * 0.1,
        # after_norm LayerNorm default init
        "ln_g": jnp.ones((d_model,), jnp.float32),
        "ln_b": jnp.zeros((d_model,), jnp.float32),
    }

    fwd = jax.jit(functools.partial(base_encoder_forward, d_model=d_model, time_tile=16))
    out, masks_sub = fwd(xs, xs_lens, params)
    jax.block_until_ready((out, masks_sub))

    Tp = (T - 3) // 2 + 1
    assert out.shape == (B, Tp, d_model)
    assert masks_sub.shape == (B, 1, Tp)
    assert bool(jnp.all(jnp.isfinite(out)))

    ref_out, ref_masks = _reference_forward(xs, xs_lens, params, d_model)
    assert bool(jnp.all(masks_sub == ref_masks))
    max_err = float(jnp.max(jnp.abs(out - ref_out)))
    assert max_err < 2e-2, f"max abs err vs reference: {max_err}"

    print("KERNEL_OK")
</pallas_src>

<mosaic_0001>
module attributes {stable_mosaic.version = 11 : i64} {
  func.func @fused_subsample_posenc_ln_kernel(%arg0: i32, %arg1: i32, %arg2: memref<1x16x48xbf16, #tpu.memory_space<vmem>>, %arg3: memref<48x896xbf16, #tpu.memory_space<vmem>>, %arg4: memref<1x896xf32, #tpu.memory_space<vmem>>, %arg5: memref<896x128xbf16, #tpu.memory_space<vmem>>, %arg6: memref<1x128xf32, #tpu.memory_space<vmem>>, %arg7: memref<16x128xf32, #tpu.memory_space<vmem>>, %arg8: memref<1x128xf32, #tpu.memory_space<vmem>>, %arg9: memref<1x128xf32, #tpu.memory_space<vmem>>, %arg10: memref<1x16x128xf32, #tpu.memory_space<vmem>>) attributes {dimension_semantics = [#tpu.dimension_semantics<parallel>, #tpu.dimension_semantics<parallel>], iteration_bounds = array<i64: 2, 2>, scalar_prefetch = 0 : i64, scratch_operands = 0 : i64, tpu.core_type = #tpu.core_type<tc>, window_params = [{transform_indices = @transform_0, window_bounds = array<i64: 1, 16, 48>}, {pipeline_mode = #tpu.pipeline_mode<synchronous>, transform_indices = @transform_1, window_bounds = array<i64: 48, 896>}, {pipeline_mode = #tpu.pipeline_mode<synchronous>, transform_indices = @transform_2, window_bounds = array<i64: 1, 896>}, {pipeline_mode = #tpu.pipeline_mode<synchronous>, transform_indices = @transform_3, window_bounds = array<i64: 896, 128>}, {pipeline_mode = #tpu.pipeline_mode<synchronous>, transform_indices = @transform_4, window_bounds = array<i64: 1, 128>}, {transform_indices = @transform_5, window_bounds = array<i64: 16, 128>}, {pipeline_mode = #tpu.pipeline_mode<synchronous>, transform_indices = @transform_6, window_bounds = array<i64: 1, 128>}, {pipeline_mode = #tpu.pipeline_mode<synchronous>, transform_indices = @transform_7, window_bounds = array<i64: 1, 128>}, {transform_indices = @transform_8, window_bounds = array<i64: 1, 16, 128>}]} {
    %c0 = arith.constant 0 : index
    %c0_0 = arith.constant 0 : index
    %c0_1 = arith.constant 0 : index
    %0 = vector.load %arg2[%c0, %c0_0, %c0_1] : memref<1x16x48xbf16, #tpu.memory_space<vmem>>, vector<1x16x48xbf16>
    %1 = vector.shape_cast %0 : vector<1x16x48xbf16> to vector<16x48xbf16>
    %c0_2 = arith.constant 0 : index
    %c0_3 = arith.constant 0 : index
    %2 = vector.load %arg3[%c0_2, %c0_3] : memref<48x896xbf16, #tpu.memory_space<vmem>>, vector<48x896xbf16>
    %cst = arith.constant dense<0.000000e+00> : vector<16x896xf32>
    %3 = tpu.matmul %1, %2, %cst {dimension_numbers = #tpu.dot_dimension_numbers<[1], [0], [0], [1], [0, 0, 1, 1], [], []>} : vector<16x48xbf16>, vector<48x896xbf16>, vector<16x896xf32> -> vector<16x896xf32>
    %c0_4 = arith.constant 0 : index
    %c0_5 = arith.constant 0 : index
    %4 = vector.load %arg4[%c0_4, %c0_5] : memref<1x896xf32, #tpu.memory_space<vmem>>, vector<1x896xf32>
    %5 = vector.broadcast %4 : vector<1x896xf32> to vector<16x896xf32>
    %6 = arith.addf %3, %5 : vector<16x896xf32>
    %cst_6 = arith.constant 0.000000e+00 : f32
    %7 = vector.broadcast %cst_6 : f32 to vector<16x896xf32>
    %8 = arith.maximumf %6, %7 : vector<16x896xf32>
    %9 = arith.truncf %8 : vector<16x896xf32> to vector<16x896xbf16>
    %c0_7 = arith.constant 0 : index
    %c0_8 = arith.constant 0 : index
    %10 = vector.load %arg5[%c0_7, %c0_8] : memref<896x128xbf16, #tpu.memory_space<vmem>>, vector<896x128xbf16>
    %cst_9 = arith.constant dense<0.000000e+00> : vector<16x128xf32>
    %11 = tpu.matmul %9, %10, %cst_9 {dimension_numbers = #tpu.dot_dimension_numbers<[1], [0], [0], [1], [0, 0, 1, 1], [], []>} : vector<16x896xbf16>, vector<896x128xbf16>, vector<16x128xf32> -> vector<16x128xf32>
    %c0_10 = arith.constant 0 : index
    %c0_11 = arith.constant 0 : index
    %12 = vector.load %arg6[%c0_10, %c0_11] : memref<1x128xf32, #tpu.memory_space<vmem>>, vector<1x128xf32>
    %13 = vector.broadcast %12 : vector<1x128xf32> to vector<16x128xf32>
    %14 = arith.addf %11, %13 : vector<16x128xf32>
    %c0_12 = arith.constant 0 : index
    %c0_13 = arith.constant 0 : index
    %15 = vector.load %arg7[%c0_12, %c0_13] : memref<16x128xf32, #tpu.memory_space<vmem>>, vector<16x128xf32>
    %16 = arith.addf %14, %15 : vector<16x128xf32>
    %cst_14 = arith.constant dense<0.000000e+00> : vector<16xf32>
    %17 = vector.multi_reduction <add>, %16, %cst_14 [1] : vector<16x128xf32> to vector<16xf32>
    %18 = vector.shape_cast %17 : vector<16xf32> to vector<16x1xf32>
    %cst_15 = arith.constant 1.280000e+02 : f32
    %19 = vector.broadcast %cst_15 : f32 to vector<16x1xf32>
    %20 = arith.divf %18, %19 : vector<16x1xf32>
    %21 = arith.mulf %16, %16 : vector<16x128xf32>
    %cst_16 = arith.constant dense<0.000000e+00> : vector<16xf32>
    %22 = vector.multi_reduction <add>, %21, %cst_16 [1] : vector<16x128xf32> to vector<16xf32>
    %23 = vector.shape_cast %22 : vector<16xf32> to vector<16x1xf32>
    %cst_17 = arith.constant 1.280000e+02 : f32
    %24 = vector.broadcast %cst_17 : f32 to vector<16x1xf32>
    %25 = arith.divf %23, %24 : vector<16x1xf32>
    %26 = arith.mulf %20, %20 : vector<16x1xf32>
    %27 = arith.subf %25, %26 : vector<16x1xf32>
    %28 = vector.broadcast %20 : vector<16x1xf32> to vector<16x128xf32>
    %29 = arith.subf %16, %28 : vector<16x128xf32>
    %cst_18 = arith.constant 9.99999974E-6 : f32
    %30 = vector.broadcast %cst_18 : f32 to vector<16x1xf32>
    %31 = arith.addf %27, %30 : vector<16x1xf32>
    %32 = math.rsqrt %31 : vector<16x1xf32>
    %33 = vector.broadcast %32 : vector<16x1xf32> to vector<16x128xf32>
    %34 = arith.mulf %29, %33 : vector<16x128xf32>
    %c0_19 = arith.constant 0 : index
    %c0_20 = arith.constant 0 : index
    %35 = vector.load %arg8[%c0_19, %c0_20] : memref<1x128xf32, #tpu.memory_space<vmem>>, vector<1x128xf32>
    %36 = vector.broadcast %35 : vector<1x128xf32> to vector<16x128xf32>
    %37 = arith.mulf %34, %36 : vector<16x128xf32>
    %c0_21 = arith.constant 0 : index
    %c0_22 = arith.constant 0 : index
    %38 = vector.load %arg9[%c0_21, %c0_22] : memref<1x128xf32, #tpu.memory_space<vmem>>, vector<1x128xf32>
    %39 = vector.broadcast %38 : vector<1x128xf32> to vector<16x128xf32>
    %40 = arith.addf %37, %39 : vector<16x128xf32>
    %c0_23 = arith.constant 0 : index
    %c0_24 = arith.constant 0 : index
    %c0_25 = arith.constant 0 : index
    %41 = vector.load %arg10[%c0_23, %c0_24, %c0_25] : memref<1x16x128xf32, #tpu.memory_space<vmem>>, vector<1x16x128xf32>
    %42 = vector.shape_cast %41 : vector<1x16x128xf32> to vector<16x128xf32>
    %43 = vector.shape_cast %40 : vector<16x128xf32> to vector<1x16x128xf32>
    tpu.vector_store %arg10[%c0_23, %c0_24, %c0_25], %43 {strides = array<i32>} : memref<1x16x128xf32, #tpu.memory_space<vmem>>, vector<1x16x128xf32>,
    return
  }
  func.func @transform_0(%arg0: i32, %arg1: i32) -> (i32, i32, i32) {
    %c0_i32 = arith.constant 0 : i32
    %c0_i32_0 = arith.constant 0 : i32
    return %arg0, %arg1, %c0_i32 : i32, i32, i32
  }
  func.func @transform_1(%arg0: i32, %arg1: i32) -> (i32, i32) {
    %c0_i32 = arith.constant 0 : i32
    %c0_i32_0 = arith.constant 0 : i32
    %c0_i32_1 = arith.constant 0 : i32
    return %c0_i32, %c0_i32_0 : i32, i32
  }
  func.func @transform_2(%arg0: i32, %arg1: i32) -> (i32, i32) {
    %c0_i32 = arith.constant 0 : i32
    %c0_i32_0 = arith.constant 0 : i32
    %c0_i32_1 = arith.constant 0 : i32
    return %c0_i32, %c0_i32_0 : i32, i32
  }
  func.func @transform_3(%arg0: i32, %arg1: i32) -> (i32, i32) {
    %c0_i32 = arith.constant 0 : i32
    %c0_i32_0 = arith.constant 0 : i32
    %c0_i32_1 = arith.constant 0 : i32
    return %c0_i32, %c0_i32_0 : i32, i32
  }
  func.func @transform_4(%arg0: i32, %arg1: i32) -> (i32, i32) {
    %c0_i32 = arith.constant 0 : i32
    %c0_i32_0 = arith.constant 0 : i32
    %c0_i32_1 = arith.constant 0 : i32
    return %c0_i32, %c0_i32_0 : i32, i32
  }
  func.func @transform_5(%arg0: i32, %arg1: i32) -> (i32, i32) {
    %c0_i32 = arith.constant 0 : i32
    %c0_i32_0 = arith.constant 0 : i32
    return %arg1, %c0_i32 : i32, i32
  }
  func.func @transform_6(%arg0: i32, %arg1: i32) -> (i32, i32) {
    %c0_i32 = arith.constant 0 : i32
    %c0_i32_0 = arith.constant 0 : i32
    %c0_i32_1 = arith.constant 0 : i32
    return %c0_i32, %c0_i32_0 : i32, i32
  }
  func.func @transform_7(%arg0: i32, %arg1: i32) -> (i32, i32) {
    %c0_i32 = arith.constant 0 : i32
    %c0_i32_0 = arith.constant 0 : i32
    %c0_i32_1 = arith.constant 0 : i32
    return %c0_i32, %c0_i32_0 : i32, i32
  }
  func.func @transform_8(%arg0: i32, %arg1: i32) -> (i32, i32, i32) {
    %c0_i32 = arith.constant 0 : i32
    %c0_i32_0 = arith.constant 0 : i32
    return %arg0, %arg1, %c0_i32 : i32, i32, i32
  }
}

</mosaic_0001>

<bundles_post_ra>
// kernel: base_encoder_forward.1
= control target key start
LH: loop header
LB: loop body
LE: loop exit
PB: predicated region body
PF: predicated region fallthrough
CT: control target
= control target key end

     0   :  { %13 = vsyncpa [#allocation3], 0  ;;  %s2464_s0 = inlined_call_operand.vmem [shape: bf16[2,32,48], index: 0, kind: input, shape index: {}]   ;;  %s2465_s1 = inlined_call_operand.vmem [shape: bf16[48,896], index: 1, kind: input, shape index: {}]   ;;  %s2466_s2 = inlined_call_operand.vmem [shape: f32[1,896], index: 2, kind: input, shape index: {}]   ;;  %s2467_s3 = inlined_call_operand.vmem [shape: bf16[896,128], index: 3, kind: input, shape index: {}]   ;;  %s2468_s4 = inlined_call_operand.vmem [shape: f32[1,128], index: 4, kind: input, shape index: {}]   ;;  %s2469_s5 = inlined_call_operand.vmem [shape: f32[32,128], index: 5, kind: input, shape index: {}]   ;;  %s2470_s6 = inlined_call_operand.vmem [shape: f32[1,128], index: 6, kind: input, shape index: {}]   ;;  %s2471_s7 = inlined_call_operand.vmem [shape: f32[1,128], index: 7, kind: input, shape index: {}]   ;;  %s2472_s8 = inlined_call_operand.hbm [shape: f32[2,32,128], index: 8, kind: output, shape index: {}]  }
   0x1   :  { %15 = vsyncpa [#allocation3 + $0x1], 0  ;;  %s2032_s27 = smov 0   ;;  %s2034_s28 = smov 0  }
   0x2   :  { %s2036_s29 = smov 0   ;;  %s2038_s30 = smov 0  }
   0x3   :  { %s2040_s9 = smov 0   ;;  %s2042_s10 = smov 0  }
   0x4   :  { %s2044_s11 = smov 0   ;;  %s2046_s12 = smov 0  }
   0x5 LB: > { %2477 = sst [smem:[#allocation5_spill]] %s1971_s10  ;;  %s1509_s13 = sadd.s32 4294967295, %s1979_s12   ;;  %s1979_s12 = sphi %s2046_s12, %s21_s12   ;;  %s1975_s11 = sphi %s2044_s11, %s2486_s11   ;;  %s1971_s10 = sphi %s2042_s10, %s2485_s10   ;;  %s1967_s9 = sphi %s2040_s9, %s2484_s9   ;;  %s1963_s30 = sphi %s2038_s30, %s2483_s30   ;;  %s1959_s29 = sphi %s2036_s29, %s2489_s29   ;;  %s1955_s28 = sphi %s2034_s28, %s2488_s28   ;;  %s1951_s27 = sphi %s2032_s27, %s2487_s27  }
   0x6   : > { %2478 = sst [smem:[#allocation6_spill]] %s1975_s11  ;;  %s1510_s14 = sadd.s32 4294967294, %s1979_s12  }
   0x7   : > { %s30_s15 = sadd.s32 1, %s1971_s10  ;;  %s33_s16 = sadd.s32 1, %s1975_s11 }
   0x8   : > { %p31_p0 = scmp.ge.s32.totalorder %s30_s15, 2  ;;  %p232_p1 = scmp.ne.s32.totalorder %s1959_s29, %s1955_s28 }
   0x9   : > { %p233_p2 = scmp.eq.s32.totalorder %s1509_s13, 3  ;;  %p238_p5 = scmp.ne.s32.totalorder %s1955_s28, %s1951_s27 }
   0xa   : > { %s2491_s15 = smov (%p31_p0, %s30_s15), 0  ;;  %s2493_s16 = smov (!%p31_p0, %s33_s16), %s1975_s11 }
   0xb   : > { %2479 = sst [smem:[#allocation7_spill]] %s2491_s15  ;;  %s218_s17 = ssub.s32 %s1971_s10, %s2491_s15 }
   0xc   : > { %p2083_p3 = por %p233_p2, %p232_p1  ;;  %p35_p4 = scmp.ge.s32.totalorder %s2493_s16, 2 }
   0xd   : > { %p239_p6 = scmp.eq.s32.totalorder %s1510_s14, 3  ;;  %p1513_p7 = scmp.ge.s32.totalorder %s1979_s12, 1 }
   0xe   : > { %s2495_s16 = smov (%p35_p4, %s2493_s16), 0  ;;  %p297_p9 = scmp.lt.s32.totalorder %s1979_s12, 5 }
   0xf   : > { %2481 = sst [smem:[#allocation8_spill]] %s2495_s16  ;;  %p2092_p8 = por %p239_p6, %p238_p5 }
  0x10   : > { %s217_s20 = ssub.s32 %s1975_s11, %s2495_s16  ;;  %s222_s21 = sadd.s32 1, %s1959_s29 }
  0x11   : > { %s219_s22 = sor.u32 %s218_s17, %s217_s20  ;;  %p298_p10 = pnand %p1513_p7, %p297_p9 }
  0x12   : > { %p220_p11 = scmp.eq.s32.totalorder %s219_s22, 0  ;;  %s2107_s26 = sshll.u32 (!%p298_p10), %s1963_s30, 1 }
  0x13   : > { %301 = sbr.rel (%p298_p10) target bundleno = 663 (0x297), region = 52  ;;  %p341_p12 = scmp.lt.s32.totalorder (!%p298_p10), %s1967_s9, 1 }
  0x14   : > { %s2101_s23 = scalar_select %p220_p11, %s1959_s29, %s222_s21  }
  0x15   : > { %p343_p13 = scmp.lt.s32.totalorder (!%p298_p10), %s2107_s26, 3  ;;  %s1607_s16 = sshll.u32 (!%p298_p10), %s1967_s9, 2 }
  0x16   : > { %s1412_s24 = sadd.s32 (!%p298_p10), %s1607_s16, %s2107_s26  ;;  %s1984_s20 = smov (!%p298_p10), [#allocation2]  }
  0x17   : > { %s1608_s11 = sshll.u32 (!%p298_p10), %s1412_s24, 7 }
  0x18   : > { %v1796_v0 = vld [vmem:[%s2465_s1 + $0x74] ss:$28 sps:$4 sm:$0xff]   ;;  %v1798_v1 = vld [vmem:[%s2465_s1 + $0x7c] ss:$28 sps:$4 sm:$0xff]   ;;  %v1981_v2 = vmov 0   ;;  %s342_s25 = scalar_select %p341_p12, %s1967_s9, 1  ;;  %v386_v57 = vlaneseq }
  0x19   : > { %570 = vmatprep.mubr.bf16.mxu0 %v1981_v2  ;;  %613 = vmatprep.mubr.bf16.mxu1 %v1981_v2  ;;  %v1800_v3 = vld [vmem:[%s2465_s1 + $0x70] ss:$28 sps:$4 sm:$0xff]   ;;  %v1801_v4 = vld [vmem:[%s2465_s1 + $0x78] ss:$28 sps:$4 sm:$0xff]   ;;  %v1804_v6 = vld [vmem:[%s2465_s1 + $0x44] ss:$28 sps:$4 sm:$0xff]  }
  0x1a   : > { %548 = vmatprep.subr.bf16.mxu0 %v1796_v0  ;;  %591 = vmatprep.subr.bf16.mxu1 %v1798_v1  ;;  %v1802_v5 = vld [vmem:[%s2465_s1 + $0x3c] ss:$28 sps:$4 sm:$0xff]   ;;  %s2131_s17 = scalar_select %p343_p13, %s2107_s26, 3  ;;  %v1808_v9 = vld [vmem:[%s2465_s1 + $0x4] ss:$28 sps:$4 sm:$0xff]   ;;  %vm534_vm0 = vcmask 392192  }
  0x1b   : > { %549 = vmatpush1.bf16.msra.mxu0 %v1800_v3  ;;  %592 = vmatpush1.bf16.msra.mxu1 %v1801_v4  ;;  %v1806_v7 = vld [vmem:[%s2465_s1 + $0x38] ss:$28 sps:$4 sm:$0xff]   ;;  %v1807_v8 = vld [vmem:[%s2465_s1 + $0x40] ss:$28 sps:$4 sm:$0xff]   ;;  %s1516_s22 = sshll.u32 %s342_s25, 2  ;;  %v1982_v17 = vmov 0.0  }
  0x1c   : > { %550 = vmatprep.subr.bf16.mxu0 %v1802_v5  ;;  %593 = vmatprep.subr.bf16.mxu1 %v1804_v6  ;;  %s346_s13 = sadd.s32 %s1516_s22, %s2131_s17  ;;  %v1810_v10 = vld [vmem:[%s2465_s1 + $0xc] ss:$28 sps:$4 sm:$0xff]   ;;  %v1812_v11 = vld [vmem:[%s2465_s1] ss:$28 sps:$4 sm:$0xff]   ;;  %v1823_v21 = vld [vmem:[%s2465_s1 + $0x14] ss:$28 sps:$4 sm:$0xff]  }
  0x1d   : > { %v1813_v12 = vld [vmem:[%s2465_s1 + $0x8] ss:$28 sps:$4 sm:$0xff]   ;;  %s1517_s25 = sshll.u32 %s346_s13, 2  ;;  %v1815_v15 = vld [vmem:[%s2465_s1 + $0x80] ss:$28 sps:$4 sm:$0xff]   ;;  %vm1983_vm1 = vmmov 0  }
  0x1e   : > { %s348_s22 = scalar_lea.vmem %s2464_s0, %s1517_s25  ;;  %v1817_v13 = vld [vmem:[%s2465_s1 + $0x84] ss:$28 sps:$4 sm:$0xff]   ;;  %v1820_v16 = vld [vmem:[%s2465_s1 + $0x4c] ss:$28 sps:$4 sm:$0xff]   ;;  %v1826_v23 = vld [vmem:[%s2465_s1 + $0x18] ss:$28 sps:$4 sm:$0xff]  }
  0x1f   : > { %551 = vmatpush1.bf16.msra.mxu0 %v1806_v7  ;;  %594 = vmatpush1.bf16.msra.mxu1 %v1807_v8  ;;  %v1814_v14 = vld [vmem:[%s348_s22] sm:$0xff]   ;;  %v1825_v20 = vld [vmem:[%s2465_s1 + $0x50] ss:$28 sps:$4 sm:$0xff]   ;;  %v1827_v24 = vld [vmem:[%s2467_s3 + $0x78] sm:$0xff]   ;;  %v2288_v58 = vshrl.u32 %v386_v57, 7  ;;  %s1519_s14 = sshll.u32 %s2131_s17, 3 }
  0x20   : > { %552 = vmatprep.subr.bf16.mxu0 %v1808_v9  ;;  %595 = vmatprep.subr.bf16.mxu1 %v1810_v10  ;;  %v1824_v18 = vld [vmem:[%s2465_s1 + $0x88] ss:$28 sps:$4 sm:$0xff]   ;;  %v1821_v22 = vld [vmem:[%s2465_s1 + $0x10] ss:$28 sps:$4 sm:$0xff]   ;;  %v1828_v25 = vld [vmem:[%s2467_s3 + $0xf8] sm:$0xff]   ;;  %s354_s13 = scalar_lea.vmem %s2469_s5, %s1519_s14  ;;  %s337_s17 = sand.u32 1, %s1955_s28  }
  0x21   : > { %v1818_v19 = vld [vmem:[%s2465_s1 + $0x48] ss:$28 sps:$4 sm:$0xff]   ;;  %v1829_v26 = vld [vmem:[%s2467_s3 + $0x38] sm:$0xff]   ;;  %v1831_v28 = vld [vmem:[%s2467_s3 + $0x70] sm:$0xff]   ;;  %v396_v59 = vsub.s32 2, %v2288_v58  ;;  %v400_v60 = vsub.s32 3, %v2288_v58 }
  0x22   : > { %v1830_v27 = vld [vmem:[%s2467_s3 + $0xb8] sm:$0xff]   ;;  %v1832_v29 = vld [vmem:[%s2467_s3 + $0xf0] sm:$0xff]   ;;  %v1835_v32 = vld [vmem:[%s2467_s3 + $0x68] sm:$0xff]   ;;  %v392_v62 = vsub.s32 1, %v2288_v58  ;;  %v388_v63 = vsub.s32 0, %v2288_v58  ;;  %s1514_s21 = sshll.u32 %s337_s17, 4 }
  0x23   : > { %553 = vmatpush1.bf16.msra.mxu0 %v1812_v11  ;;  %596 = vmatpush1.bf16.msra.mxu1 %v1813_v12  ;;  %v1833_v30 = vld [vmem:[%s2467_s3 + $0x30] sm:$0xff]   ;;  %v1836_v33 = vld [vmem:[%s2467_s3 + $0xe8] sm:$0xff]   ;;  %v1839_v36 = vld [vmem:[%s2467_s3 + $0x60] sm:$0xff]   ;;  %s339_s9 = scalar_lea.vmem [#allocation2], %s1514_s21  ;;  %s2413_s26 = scalar_lea.sflag [#allocation3], %s337_s17 }
  0x24   : > { %634 = vmatprep.subr.bf16.mxu0 %v1817_v13  ;;  %1690 = vmatprep.subr.bf16.mxu1 %v1982_v17  ;;  %v1834_v31 = vld [vmem:[%s2467_s3 + $0xb0] sm:$0xff]   ;;  %v1837_v34 = vld [vmem:[%s2467_s3 + $0x28] sm:$0xff]   ;;  %v1840_v37 = vld [vmem:[%s2467_s3 + $0xe0] sm:$0xff]   ;;  %s1415_s14 = sshll.u32 %s339_s9, 4  ;;  %s1891_s25 = sshll.u32 %s1984_s20, 4  ;;  %s2411_s14 = int_to_ptr.vmem [resolvable:$true] %s1415_s14  ;;  %s1892_s25 = int_to_ptr.vmem [resolvable:$false] %s1891_s25 }
  0x25   : > { %v1838_v35 = vld [vmem:[%s2467_s3 + $0xa8] sm:$0xff]   ;;  %v1841_v38 = vld [vmem:[%s2467_s3 + $0x20] sm:$0xff]   ;;  %v1843_v40 = vld [vmem:[%s2467_s3 + $0x58] sm:$0xff]   ;;  %s1887_s16 = scalar_lea.vmem %s2411_s14, 256  ;;  %s1893_s21 = scalar_lea.vmem %s1892_s25, 512 }
  0x26   : > { %1542 = vmatmul.mubr.msk.bf16.vlgmr.msra.gmra.mxu0 %vm534_vm0, %v1814_v14  ;;  %1543 = vmatmul.mubr.msk.bf16.vlgmr.msra.gmra.mxu1 %vm534_vm0, %v1814_v14  ;;  %v1842_v39 = vld [vmem:[%s2467_s3 + $0xa0] sm:$0xff]   ;;  %v1844_v41 = vld [vmem:[%s2467_s3 + $0xd8] sm:$0xff]   ;;  %v1847_v44 = vld [vmem:[%s2467_s3 + $0x50] sm:$0xff]   ;;  %p1888_p0 = scmp.ne.s32.totalorder %s2411_s14, %s1887_s16  ;;  %p1894_p4 = scmp.lt.s32.totalorder %s2411_s14, %s1892_s25 }
  0x27   : > { %635 = vmatpush1.bf16.msra.mxu0 %v1815_v15  ;;  %1691 = vmatpush3.bf16.msra.mxu1 %v1824_v18  ;;  %v1845_v42 = vld [vmem:[%s2467_s3 + $0x18] sm:$0xff]   ;;  %v1848_v45 = vld [vmem:[%s2467_s3 + $0xd0] sm:$0xff]   ;;  %v1851_v48 = vld [vmem:[%s2467_s3 + $0x48] sm:$0xff]   ;;  %p1895_p5 = scmp.lt.s32.totalorder %s1893_s21, %s1887_s16 }
  0x28   : > { %636 = vmatprep.subr.bf16.mxu0 %v1820_v16  ;;  %656 = vmatprep.mubr.bf16.mxu0 %v1981_v2  ;;  %v1846_v43 = vld [vmem:[%s2467_s3 + $0x98] sm:$0xff]   ;;  %v1849_v46 = vld [vmem:[%s2467_s3 + $0x10] sm:$0xff]   ;;  %v1852_v49 = vld [vmem:[%s2467_s3 + $0xc8] sm:$0xff]   ;;  %p1889_p1 = pnand %p1888_p0, %p2083_p3 }
  0x29   : > { %1692 = vmatprep.subr.bf16.mxu1 %v1982_v17  ;;  %1696 = vmatprep.mubr.msk.bf16.mxu1 %vm1983_vm1, %v1982_v17  ;;  %v1850_v47 = vld [vmem:[%s2467_s3 + $0x90] sm:$0xff]   ;;  %v1853_v50 = vld [vmem:[%s2467_s3 + $0x8] sm:$0xff]   ;;  %v1855_v52 = vld [vmem:[%s2467_s3 + $0x40] sm:$0xff]   ;;  %p1896_p6 = por %p1895_p5, %p1894_p4 }
  0x2a   : > { %v1854_v51 = vld [vmem:[%s2467_s3 + $0x88] sm:$0xff]   ;;  %v1856_v53 = vld [vmem:[%s2467_s3 + $0xc0] sm:$0xff]   ;;  %v1859_v56 = vld [vmem:[%s2467_s3 + $0x178] sm:$0xff]   ;;  %p1890_p2 = pneg %p1889_p1 }
  0x2b   : > { %637 = vmatpush1.bf16.msra.mxu0 %v1818_v19  ;;  %1693 = vmatpush3.bf16.msra.mxu1 %v1825_v20  ;;  %v1857_v54 = vld [vmem:[%s2467_s3] sm:$0xff]   ;;  %v408_v20 = vsub.s32 5, %v2288_v58 }
  0x2c   : > { %638 = vmatprep.subr.bf16.mxu0 %v1823_v21  ;;  %1694 = vmatprep.subr.bf16.mxu1 %v1982_v17  ;;  %v1858_v55 = vld [vmem:[%s2467_s3 + $0x80] sm:$0xff]   ;;  %p1897_p7 = pnand %p1896_p6, %p1890_p2 }
  0x2d   : > { %v2295_v61 = vld [vmem:[%s2466_s2] sm:$0xff] }
  0x2e   : > { %v397_v0 = vrot.slane %v2295_v61, %v396_v59  ;;  %v401_v1 = vrot.slane %v2295_v61, %v400_v60  ;;  %v393_v4 = vrot.slane %v2295_v61, %v392_v62  ;;  %v389_v5 = vrot.slane %v2295_v61, %v388_v63  ;;  %v1870_v57 = vld [vmem:[%s2467_s3 + $0x1a0] sm:$0xff]   ;;  %v1871_v60 = vld [vmem:[%s2467_s3 + $0x158] sm:$0xff]  }
  0x2f   : > { %639 = vmatpush1.bf16.msra.mxu0 %v1821_v22  ;;  %1695 = vmatpush3.bf16.msra.mxu1 %v1826_v23  ;;  %v412_v62 = vsub.s32 6, %v2288_v58  ;;  %v1872_v63 = vld [vmem:[%s2467_s3 + $0x118] sm:$0xff]  }
  0x30   : > { %1615 = vmatprep.subr.bf16.mxu0 %v1827_v24  ;;  %1637 = vmatprep.subr.bf16.mxu1 %v1828_v25 }
  0x32   : > { %1544 = vmatmul.mubr.msk.bf16.vlgmr.msra.gmra.mxu0 %vm534_vm0, %v1814_v14  ;;  %1697 = vmatmul.mubr.msk.bf16.vlgmr.msra.gmra.mxu1 %vm534_vm0, %v1814_v14 }
  0x33   : > { %1616 = vmatpush3.bf16.msra.mxu0 %v1829_v26  ;;  %1638 = vmatpush3.bf16.msra.mxu1 %v1830_v27 }
  0x34   : > { %1617 = vmatprep.subr.bf16.mxu0 %v1831_v28  ;;  %1639 = vmatprep.subr.bf16.mxu1 %v1832_v29 }
  0x37   : > { %1618 = vmatpush3.bf16.msra.mxu0 %v1833_v30  ;;  %1640 = vmatpush3.bf16.msra.mxu1 %v1834_v31 }
  0x38   : > { %1619 = vmatprep.subr.bf16.mxu0 %v1835_v32  ;;  %1641 = vmatprep.subr.bf16.mxu1 %v1836_v33  ;;  %v1860_v33 = vld [vmem:[%s2467_s3 + $0x138] sm:$0xff]  }
  0x3b   : > { %1620 = vmatpush3.bf16.msra.mxu0 %v1837_v34  ;;  %1642 = vmatpush3.bf16.msra.mxu1 %v1838_v35  ;;  %v1861_v34 = vld [vmem:[%s2467_s3 + $0x1b8] sm:$0xff]   ;;  %v409_v35 = vrot.slane %v2295_v61, %v408_v20 }
  0x3c   : > { %1621 = vmatprep.subr.bf16.mxu0 %v1839_v36  ;;  %1643 = vmatprep.subr.bf16.mxu1 %v1840_v37  ;;  %v1862_v37 = vld [vmem:[%s2467_s3 + $0x170] sm:$0xff]  }
  0x3f   : > { %1622 = vmatpush3.bf16.msra.mxu0 %v1841_v38  ;;  %1644 = vmatpush3.bf16.msra.mxu1 %v1842_v39 }
  0x40   : > { %1623 = vmatprep.subr.bf16.mxu0 %v1843_v40  ;;  %1645 = vmatprep.subr.bf16.mxu1 %v1844_v41 }
  0x43   : > { %1624 = vmatpush3.bf16.msra.mxu0 %v1845_v42  ;;  %1646 = vmatpush3.bf16.msra.mxu1 %v1846_v43  ;;  %v1863_v42 = vld [vmem:[%s2467_s3 + $0x130] sm:$0xff]  }
  0x44   : > { %1625 = vmatprep.subr.bf16.mxu0 %v1847_v44  ;;  %1647 = vmatprep.subr.bf16.mxu1 %v1848_v45  ;;  %v1864_v43 = vld [vmem:[%s2467_s3 + $0x1b0] sm:$0xff]   ;;  %v1865_v45 = vld [vmem:[%s2467_s3 + $0x168] sm:$0xff]  }
  0x47   : > { %1626 = vmatpush3.bf16.msra.mxu0 %v1849_v46  ;;  %1648 = vmatpush3.bf16.msra.mxu1 %v1850_v47 }
  0x48   : > { %1627 = vmatprep.subr.bf16.mxu0 %v1851_v48  ;;  %1649 = vmatprep.subr.bf16.mxu1 %v1852_v49 }
  0x4b   : > { %1628 = vmatpush3.bf16.msra.mxu0 %v1853_v50  ;;  %1650 = vmatpush3.bf16.msra.mxu1 %v1854_v51  ;;  %v1866_v50 = vld [vmem:[%s2467_s3 + $0x128] sm:$0xff]  }
  0x4c   : > { %1629 = vmatprep.subr.bf16.mxu0 %v1855_v52  ;;  %1651 = vmatprep.subr.bf16.mxu1 %v1856_v53  ;;  %v1867_v51 = vld [vmem:[%s2467_s3 + $0x1a8] sm:$0xff]  }
  0x4f   : > { %1630 = vmatpush3.bf16.msra.mxu0 %v1857_v54  ;;  %1652 = vmatpush3.bf16.msra.mxu1 %v1858_v55  ;;  %v1868_v54 = vld [vmem:[%s2467_s3 + $0x160] sm:$0xff]  }
  0x50   : > { %1700 = vmatprep.subr.bf16.mxu1 %v1982_v17  ;;  %1659 = vmatprep.subr.bf16.mxu0 %v1859_v56  ;;  %v1869_v56 = vld [vmem:[%s2467_s3 + $0x120] sm:$0xff]  }
  0xe6   : > { %v572_v2 = vpop.f32.mrf.mxu0  ;;  %v615_v3 = vpop.f32.mrf.mxu1 }
  0xe7   : > { %v616_v6 = vadd.f32 %v615_v3, %v397_v0  ;;  %v573_v15 = vadd.f32 %v572_v2, %v389_v5  ;;  %v1874_v2 = vld [vmem:[%s2467_s3 + $0x150] sm:$0xff]   ;;  %v413_v3 = vrot.slane %v2295_v61, %v412_v62 }
  0xe8   : > { %v574_v7 = vpop.f32.mrf.mxu0  ;;  %v617_v8 = vpop.f32.mrf.mxu1 }
  0xe9   : > { %v618_v9 = vadd.f32 %v617_v8, %v401_v1  ;;  %v575_v12 = vadd.f32 %v574_v7, %v393_v4  ;;  %v710_v16 = vmax.f32 %v616_v6, 0.0  ;;  %v708_v29 = vmax.f32 %v573_v15, 0.0  ;;  %v1877_v6 = vld [vmem:[%s2467_s3 + $0x148] sm:$0xff]   ;;  %v1881_v15 = vld [vmem:[%s2467_s3 + $0x100] sm:$0xff]  }
  0xea   : > { %v576_v10 = vpop.f32.mrf.mxu0  ;;  %v619_v11 = vpop.f32.mrf.mxu1 }
  0xeb   : > { %v577_v13 = vadd.f32 %v576_v10, %v389_v5  ;;  %v620_v14 = vadd.f32 %v619_v11, %v397_v0  ;;  %v711_v21 = vmax.f32 %v618_v9, 0.0  ;;  %v709_v26 = vmax.f32 %v575_v12, 0.0  ;;  %v1873_v0 = vld [vmem:[%s2467_s3 + $0x198] sm:$0xff]   ;;  %v1876_v5 = vld [vmem:[%s2467_s3 + $0x190] sm:$0xff]   ;;  %v1878_v9 = vld [vmem:[%s2467_s3 + $0x108] sm:$0xff]  }
  0xec   : > { %v578_v18 = vpop.f32.mrf.mxu0  ;;  %v621_v19 = vpop.f32.mrf.mxu1  ;;  %v1879_v10 = vld [vmem:[%s2467_s3 + $0x188] sm:$0xff]   ;;  %v1880_v12 = vld [vmem:[%s2467_s3 + $0x140] sm:$0xff]  }
  0xed   : > { %v717_v22 = vmax.f32 %v620_v14, 0.0  ;;  %v579_v23 = vadd.f32 %v578_v18, %v393_v4  ;;  %v622_v24 = vadd.f32 %v621_v19, %v401_v1  ;;  %v715_v25 = vmax.f32 %v577_v13, 0.0  ;;  %v1875_v4 = vld [vmem:[%s2467_s3 + $0x110] sm:$0xff]  }
  0xee   : > { %v404_v1 = vsub.s32 4, %v2288_v58 }
  0xef   : > { %v716_v27 = vmax.f32 %v579_v23, 0.0  ;;  %v718_v28 = vmax.f32 %v622_v24, 0.0  ;;  %v724_v30 = vpack.c.bf16 %v717_v22, %v710_v16  ;;  %v722_v36 = vpack.c.bf16 %v715_v25, %v708_v29  ;;  %v1882_v16 = vld [vmem:[%s2467_s3 + $0x180] sm:$0xff]  }
  0xf0   : > { %v405_v58 = vrot.slane %v2295_v61, %v404_v1  ;;  %v1546_v29 = vld [vmem:[%s2468_s4] ss:$0 sm:$0xff] }
  0xf1   : > { %v723_v31 = vpack.c.bf16 %v716_v27, %v709_v26  ;;  %v725_v32 = vpack.c.bf16 %v718_v28, %v711_v21 }
  0xf2   : > { %v2314_v38 = vpop.f32.mrf.mxu0  ;;  %v701_v39 = vpop.f32.mrf.mxu1 }
  0xf3   : > { %1216 = vmatprep.mubr.bf16.mxu0 %v723_v31  ;;  %1257 = vmatprep.mubr.bf16.mxu1 %v725_v32  ;;  %v702_v7 = vadd.f32 %v701_v39, %v413_v3  ;;  %v659_v61 = vadd.f32 %v2314_v38, %v405_v58 }
  0xf4   : > { %1217 = vmatmul.mubr.bf16.vlgmr.msra.gmra.mxu0 %v722_v36  ;;  %1258 = vmatmul.mubr.bf16.vlgmr.msra.gmra.mxu1 %v724_v30  ;;  %v660_v40 = vpop.f32.mrf.mxu0  ;;  %v1698_v41 = vpop.f32.mrf.mxu1 }
  0xf5   : > { %1660 = vmatpush3.bf16.msra.mxu0 %v1860_v33  ;;  %1701 = vmatpush3.bf16.msra.mxu1 %v1861_v34  ;;  %v661_v44 = vadd.f32 %v660_v40, %v409_v35  ;;  %v714_v13 = vmax.f32 %v702_v7, 0.0  ;;  %v712_v18 = vmax.f32 %v659_v61, 0.0  ;;  %v1603_v61 = vld [vmem:[%s2470_s6] ss:$0 sm:$0xff] }
  0xf6   : > { %1661 = vmatprep.subr.bf16.mxu0 %v1862_v37  ;;  %1702 = vmatprep.subr.bf16.mxu1 %v1982_v17  ;;  %v662_v46 = vpop.f32.mrf.mxu0  ;;  %v704_v47 = vpop.f32.mrf.mxu1 }
  0xf7   : > { %1716 = vmatprep.mubr.msk.bf16.mxu1 %vm1983_vm1, %v1982_v17  ;;  %v713_v52 = vmax.f32 %v661_v44, 0.0  ;;  %v705_v8 = vadd.f32 %v704_v47, %v413_v3  ;;  %v663_v11 = vadd.f32 %v662_v46, %v405_v58  ;;  %v1348_v47 = vld [vmem:[%s354_s13] sm:$0xff] }
  0xf8   : > { %v664_v48 = vpop.f32.mrf.mxu0  ;;  %v1699_v49 = vpop.f32.mrf.mxu1 }
  0xf9   : > { %1662 = vmatpush3.bf16.msra.mxu0 %v1863_v42  ;;  %1703 = vmatpush3.bf16.msra.mxu1 %v1864_v43  ;;  %v665_v53 = vadd.f32 %v664_v48, %v409_v35  ;;  %v721_v14 = vmax.f32 %v705_v8, 0.0  ;;  %v719_v19 = vmax.f32 %v663_v11, 0.0 }
  0xfa   : > { %1663 = vmatprep.subr.bf16.mxu0 %v1865_v45  ;;  %1704 = vmatprep.subr.bf16.mxu1 %v1982_v17 }
  0xfb   : > { %v720_v55 = vmax.f32 %v665_v53, 0.0  ;;  %v728_v20 = vpack.c.bf16 %v721_v14, %v714_v13  ;;  %v726_v21 = vpack.c.bf16 %v719_v19, %v712_v18  ;;  %v1349_v53 = vld [vmem:[%s354_s13 + $0x8] sm:$0xff]  ;;  %s2409_s13 = scalar_lea.hbm %s2472_s8, %s1608_s11 }
  0xfd   : > { %1664 = vmatpush3.bf16.msra.mxu0 %v1866_v50  ;;  %1705 = vmatpush3.bf16.msra.mxu1 %v1867_v51  ;;  %v727_v59 = vpack.c.bf16 %v720_v55, %v713_v52 }
  0xfe   : > { %1665 = vmatprep.subr.bf16.mxu0 %v1868_v54  ;;  %1706 = vmatprep.subr.bf16.mxu1 %v1982_v17 }
  0xff   : > { %1298 = vmatprep.mubr.bf16.mxu0 %v727_v59 }
 0x101   : > { %1666 = vmatpush3.bf16.msra.mxu0 %v1869_v56  ;;  %1707 = vmatpush3.bf16.msra.mxu1 %v1870_v57 }
 0x102   : > { %1667 = vmatprep.subr.bf16.mxu0 %v1871_v60  ;;  %1708 = vmatprep.subr.bf16.mxu1 %v1982_v17 }
 0x105   : > { %1668 = vmatpush3.bf16.msra.mxu0 %v1872_v63  ;;  %1709 = vmatpush3.bf16.msra.mxu1 %v1873_v0 }
 0x106   : > { %1669 = vmatprep.subr.bf16.mxu0 %v1874_v2  ;;  %1710 = vmatprep.subr.bf16.mxu1 %v1982_v17 }
 0x109   : > { %1670 = vmatpush3.bf16.msra.mxu0 %v1875_v4  ;;  %1711 = vmatpush3.bf16.msra.mxu1 %v1876_v5 }
 0x10a   : > { %1671 = vmatprep.subr.bf16.mxu0 %v1877_v6  ;;  %1712 = vmatprep.subr.bf16.mxu1 %v1982_v17 }
 0x10d   : > { %1672 = vmatpush3.bf16.msra.mxu0 %v1878_v9  ;;  %1713 = vmatpush3.bf16.msra.mxu1 %v1879_v10 }
 0x10e   : > { %1673 = vmatprep.subr.bf16.mxu0 %v1880_v12  ;;  %1714 = vmatprep.subr.bf16.mxu1 %v1982_v17  ;;  %v1604_v12 = vld [vmem:[%s2471_s7] ss:$0 sm:$0xff] }
 0x111   : > { %1674 = vmatpush3.bf16.msra.mxu0 %v1881_v15  ;;  %1715 = vmatpush3.bf16.msra.mxu1 %v1882_v16 }
 0x114   : > { %1299 = vmatmul.mubr.bf16.vlgmr.msra.gmra.mxu0 %v726_v21  ;;  %1717 = vmatmul.mubr.bf16.vlgmr.msra.gmra.mxu1 %v728_v20 }
 0x1b4   : > { %v1631_v22 = vpop.f32.mrf.mxu0  ;;  %v1653_v23 = vpop.f32.mrf.mxu1 }
 0x1b6   : > { %v1632_v24 = vpop.f32.mrf.mxu0  ;;  %v1654_v25 = vpop.f32.mrf.mxu1 }
 0x1b7   : > { %v1633_v28 = vadd.f32 %v1632_v24, %v1631_v22  ;;  %v1655_v35 = vadd.f32 %v1654_v25, %v1653_v23 }
 0x1b8   : > { %v1634_v26 = vpop.f32.mrf.mxu0  ;;  %v1656_v27 = vpop.f32.mrf.mxu1 }
 0x1b9   : > { %v1219_v31 = vadd.f32 %v1633_v28, %v1546_v29 }
 0x1ba   : > { %v1635_v30 = vpop.f32.mrf.mxu0  ;;  %v1657_v17 = vpop.f32.mrf.mxu1 }
 0x1bb   : > { %v1636_v32 = vadd.f32 %v1635_v30, %v1634_v26  ;;  %v1260_v38 = vadd.f32 %v1655_v35, %v1219_v31  ;;  %v1658_v43 = vadd.f32 %v1657_v17, %v1656_v27 }
 0x1bd   : > { %v1222_v39 = vadd.f32 %v1636_v32, %v1546_v29 }
 0x1bf   : > { %v1263_v48 = vadd.f32 %v1658_v43, %v1222_v39 }
 0x1d4   : > { %v1675_v33 = vpop.f32.mrf.mxu0  ;;  %v1341_v34 = vpop.f32.mrf.mxu1 }
 0x1d6   : > { %v1676_v36 = vpop.f32.mrf.mxu0  ;;  %v1718_v37 = vpop.f32.mrf.mxu1 }
 0x1d7   : > { %v1677_v40 = vadd.f32 %v1676_v36, %v1675_v33 }
 0x1d8   : > { %v1678_v41 = vpop.f32.mrf.mxu0  ;;  %v1344_v42 = vpop.f32.mrf.mxu1 }
 0x1d9   : > { %v1301_v44 = vadd.f32 %v1677_v40, %v1260_v38 }
 0x1da   : > { %v1679_v45 = vpop.f32.mrf.mxu0  ;;  %v1719_v46 = vpop.f32.mrf.mxu1 }
 0x1db   : > { %v1342_v49 = vadd.f32 %v1341_v34, %v1301_v44  ;;  %v1680_v50 = vadd.f32 %v1679_v45, %v1678_v41 }
 0x1dd   : > { %v1304_v51 = vadd.f32 %v1680_v50, %v1263_v48  ;;  %v1350_v52 = vadd.f32 %v1348_v47, %v1342_v49 }
 0x1df   : > { %v1345_v54 = vadd.f32 %v1344_v42, %v1304_v51  ;;  %1352 = vadd.xlane.f32.xlu0 %v1350_v52  ;;  %v1359_v55 = vmul.f32 %v1350_v52, %v1350_v52 }
 0x1e1   : > { %1361 = vadd.xlane.f32.xlu1 %v1359_v55  ;;  %v1351_v56 = vadd.f32 %v1349_v53, %v1345_v54 }
 0x1e3   : > { %1354 = vadd.xlane.f32.xlu0 %v1351_v56  ;;  %v1360_v57 = vmul.f32 %v1351_v56, %v1351_v56 }
 0x1e5   : > { %1363 = vadd.xlane.f32.xlu1 %v1360_v57 }
 0x268   : > { %v1353_v59 = vpop.xlane.xlu0 %1352 }
 0x269   : > { %v1357_v60 = vmul.f32 0.0078125, %v1353_v59 }
 0x26a   : > { %v1362_v62 = vpop.xlane.xlu1 %1361 }
 0x26b   : > { %v1367_v63 = vmul.f32 %v1357_v60, %v1357_v60  ;;  %v1365_v0 = vmul.f32 0.0078125, %v1362_v62  ;;  %v1371_v9 = vsub.f32 %v1350_v52, %v1357_v60 }
 0x26c   : > { %v1355_v1 = vpop.xlane.xlu0 %1354 }
 0x26d   : > { %v1369_v2 = vsub.f32 %v1365_v0, %v1367_v63  ;;  %v1358_v3 = vmul.f32 0.0078125, %v1355_v1 }
 0x26e   : > { %v1364_v4 = vpop.xlane.xlu1 %1363 }
 0x26f   : > { %v1373_v5 = vadd.f32 1e-05, %v1369_v2  ;;  %v1368_v58 = vmul.f32 %v1358_v3, %v1358_v3  ;;  %v1366_v6 = vmul.f32 0.0078125, %v1364_v4  ;;  %v1372_v13 = vsub.f32 %v1351_v56, %v1358_v3 }
 0x271   : > { %1883 = vrsqrt.f32 %v1373_v5  ;;  %v1370_v7 = vsub.f32 %v1366_v6, %v1368_v58 }
 0x273   : > { %v1374_v8 = vadd.f32 1e-05, %v1370_v7 }
 0x275   : > { %1885 = vrsqrt.f32 %v1374_v8 }
 0x27e   : > { %v1884_v10 = vpop.eup %1883 }
 0x27f   : > { %v1377_v11 = vmul.f32 %v1884_v10, %v1371_v9 }
 0x281   : > { %v1386_v14 = vmul.f32 %v1603_v61, %v1377_v11 }
 0x282   : > { %v1886_v15 = vpop.eup %1885 }
 0x283   : > { %v1378_v16 = vmul.f32 %v1886_v15, %v1372_v13  ;;  %v1395_v18 = vadd.f32 %v1604_v12, %v1386_v14 }
 0x285   : > { %v1387_v19 = vmul.f32 %v1603_v61, %v1378_v16  ;;  %1397 = vst [vmem:[%s339_s9] sm:$0xff] %v1395_v18 }
 0x287   : > { %v1396_v20 = vadd.f32 %v1604_v12, %v1387_v19 }
 0x289   : > { %1398 = vst [vmem:[%s339_s9 + $0x8] sm:$0xff] %v1396_v20 }
 0x28a   : > { %1900 = shalt.err (!%p1897_p7)
}
 0x28b   : > { %s1901_s17 = scalar_lea.hbm %s2409_s13, 256  ;;  %s1905_s24 = scalar_lea.hbm %s2472_s8, 1024 }
 0x28c   : > { %p1902_p9 = scmp.ne.s32.totalorder %s2409_s13, %s1901_s17  ;;  %p1906_p12 = scmp.lt.s32.totalorder %s2409_s13, %s2472_s8 }
 0x28d   : > { %p1907_p13 = scmp.lt.s32.totalorder %s1905_s24, %s1901_s17 }
 0x28e   : > { %p1903_p10 = pnand %p1902_p9, %p2083_p3 }
 0x28f   : > { %p1908_p0 = por %p1907_p13, %p1906_p12 }
 0x290   : > { %p1904_p11 = pneg %p1903_p10 }
 0x292   : > { %p1909_p1 = pnand %p1908_p0, %p1904_p11 }
 0x294   : > { %1912 = shalt.err (!%p1909_p1)
}
 0x295   : > { %s1985_s15 = smov 128   ;;  %s1986_s10 = smov 8  }
 0x296   : > { %1720 = dma.vmem_to_hbm [thread:$0]  (%p2083_p3), %s2411_s14, 256, %s2409_s13, %s2413_s26, %s1985_s15, %s1985_s15, %s1986_s10  }
 0x297 PF: > { %p1726_p2 = scmp.ge.s32.totalorder %s1979_s12, 2  ;;  %s1430_s16 = sand.u32 1, %s1951_s27  }
 0x298   : > { %s1431_s20 = scalar_lea.sflag [#allocation3], %s1430_s16 }
 0x299   : > { %p1723_p4 = pnand %p1726_p2, %p2092_p8 }
 0x29b   : > { %p1724_p5 = pneg %p1723_p4 }
 0x29d   : > { %1946 = dma.done.wait (%p1724_p5), %s1431_s20, 256  }
 0x29e   : > { %1948 = vsyncadd (%p1724_p5), %s1431_s20, 4294967040  ;;  %s21_s12 = sadd.s32 1, %s1979_s12   ;;  %s2483_s30 = sld [smem:[#allocation5_spill]] }
 0x29f   : > { %p18_p6 = scmp.ge.s32.totalorder %s21_s12, 6   ;;  %s2484_s9 = sld [smem:[#allocation6_spill]] }
 0x2a0   : > { %s2485_s10 = sld [smem:[#allocation7_spill]]  ;;  %s2487_s27 = smov %s1955_s28 }
 0x2a1   : > { %s2486_s11 = sld [smem:[#allocation8_spill]]  ;;  %s2488_s28 = smov %s1959_s29 }
 0x2a2   : > { %s2489_s29 = smov %s2101_s23  ;;  %20 = sbr.rel (!%p18_p6) target bundleno = 5 (0x5), region = 90 }
 0x2a7   :  { %1436 = vsyncpa [#allocation3], 1 }
 0x2a8   :  { %1438 = vsyncpa [#allocation3 + $0x1], 1 }

</bundles_post_ra>
